<compile_context>
chip_gen: v7x
topology: tpu7x:2x2x1
jax: 0.10.0
libtpu: 0.0.40
codegen_flags: <defaults>
</compile_context>

<pallas_src>
from functools import partial

import jax
import jax.numpy as jnp
import numpy as np
from jax.experimental import pallas as pl
from jax.experimental.pallas import tpu as pltpu


# ----------------------------------------------------------------------------- kernels

def _mp_threshold_kernel(x_ref, s_ref, *, thresh):
    # v = x ; s = (v >= thresh).  Pure elementwise compare (VPU), int8 0/1 store.
    s_ref[...] = (x_ref[...] >= thresh).astype(jnp.int8)


def _mp_fused_kernel(*refs, thresh, tc, traces, traces_additive, trace_decay,
                     trace_scale, sum_input, has_trace0, has_sum0):
    """One grid step == Tc simulation steps; trace/summed stay resident in VMEM."""
    it = iter(refs)
    x_ref = next(it)                                        # (Tc, Bt, N) input chunk
    xtr0_ref = next(it) if (traces and has_trace0) else None
    sum0_ref = next(it) if (sum_input and has_sum0) else None
    s_ref = next(it)                                        # (Tc, Bt, N) int8 spikes
    xtr_ref = next(it) if traces else None                  # (Bt, N) resident trace
    sum_ref = next(it) if sum_input else None               # (Bt, N) resident summed

    @pl.when(pl.program_id(1) == 0)                         # first T-chunk of this row tile
    def _init():
        if traces:
            xtr_ref[...] = (xtr0_ref[...] if has_trace0
                            else jnp.zeros(xtr_ref.shape, xtr_ref.dtype))
        if sum_input:
            sum_ref[...] = (sum0_ref[...] if has_sum0
                            else jnp.zeros(sum_ref.shape, sum_ref.dtype))

    # Tc is a small static int -> unrolled Python loop (static indices, LLO visibility).
    for i in range(tc):
        x = x_ref[i]
        spk = x >= thresh                                   # native-dtype compare
        s_ref[i] = spk.astype(jnp.int8)
        if traces:
            xtr = xtr_ref[...] * trace_decay                # self.x *= trace_decay
            if traces_additive:
                xtr = xtr + trace_scale * spk.astype(jnp.float32)
            else:                                           # self.x.masked_fill_(s, trace_scale)
                xtr = jnp.where(spk, jnp.float32(trace_scale), xtr)
            xtr_ref[...] = xtr
        if sum_input:
            sum_ref[...] = sum_ref[...] + x.astype(jnp.float32)   # self.summed += x.float()


# ----------------------------------------------------------------------------- helpers

_IN_TILE_BYTES = 4 * 1024 * 1024   # per input tile; with int8 output + double-buffering
                                   # total stays well under the 16 MiB default scoped VMEM
                                   # (v5e), and far under v6e/v7x limits.


def _lane_dense_view(x):
    """2-D view of `x` whose last dim is a wide multiple of 128 when possible
    (unmasked vst on a wide lane dim is the biggest measured lever for mem-bound ops)."""
    shape = x.shape
    total = int(np.prod(shape))
    n = shape[-1]
    if n % 128 == 0 and n >= 1024:
        return x.reshape(total // n, n), shape
    for lane in (4096, 2048, 1024, 512, 256, 128):
        if total % lane == 0:
            return x.reshape(total // lane, lane), shape
    return x.reshape(total // n, n), shape   # fallback: masked stores on a narrow lane


def _mp_spikes(x, *, thresh):
    """Elementwise threshold over an arbitrary-shaped slab; returns int8 spikes."""
    x2d, shape = _lane_dense_view(x)
    r, lane = x2d.shape
    itemsize = jnp.dtype(x2d.dtype).itemsize
    tm = max(_IN_TILE_BYTES // (lane * itemsize), 32)
    tm = (tm // 32) * 32           # int8 output packs (32, 128) per vreg
    tm = min(tm, r)                # tm == r (full dim) is always a legal block
    spec = pl.BlockSpec((tm, lane), lambda i: (i, 0))
    s2d = pl.pallas_call(
        partial(_mp_threshold_kernel, thresh=float(thresh)),
        grid=(pl.cdiv(r, tm),),
        in_specs=[spec],
        out_specs=pl.BlockSpec((tm, lane), lambda i: (i, 0)),
        out_shape=jax.ShapeDtypeStruct((r, lane), jnp.int8),
        compiler_params=pltpu.CompilerParams(dimension_semantics=("parallel",)),
    )(x2d)
    return s2d.reshape(shape)


def _largest_divisor_leq(n, cap):
    cap = max(1, min(cap, n))
    for d in range(cap, 0, -1):
        if n % d == 0:
            return d
    return 1


def _pick_row_tile(b):
    """Row-tile over the batch dim so v7x's two TensorCores can share the stateful path.
    int8 spike blocks want sublane multiples of 32; small B stays a single full tile."""
    if b >= 64 and b % 32 == 0:
        bt = max(32, ((b // 2) // 32) * 32)
        while b % bt != 0:
            bt -= 32
        return bt
    return b


# ----------------------------------------------------------------------------- wrappers

def mcculloch_pitts_forward(x, *, thresh=1.0):
    """Single simulation step (McCullochPitts.forward, default flags).

    Returns (v, s): v is x itself (`self.v = x` is a reference assignment in torch),
    s is an int8 0/1 spike mask (torch registers `s` as a ByteTensor)."""
    s = _mp_spikes(x, thresh=thresh)
    return x, s


def mcculloch_pitts_run(xs, *, thresh=1.0, traces=False, traces_additive=False,
                        tc_trace=20.0, trace_scale=1.0, sum_input=False, dt=1.0,
                        x_trace0=None, summed0=None):
    """Run T simulation steps.

    xs: (T, B, N) per-step inputs (native dtype; no wrapper-side cast).
    Returns dict with:
      's'       (T, B, N) int8  -- spikes for every step (0/1)
      'v'       (B, N)          -- final membrane potential (== xs[-1]; reference semantics)
      'x_trace' (B, N)    f32   -- final spike trace   (only if traces)
      'summed'  (B, N)    f32   -- final summed input  (only if sum_input)
    """
    T, B, N = xs.shape

    if not traces and not sum_input:
        # Stateless per step -> one lane-dense elementwise pass over the whole (T,B,N) slab.
        return {"s": _mp_spikes(xs, thresh=thresh), "v": xs[-1]}

    trace_decay = float(np.exp(-float(dt) / float(tc_trace)))
    has_trace0 = traces and x_trace0 is not None
    has_sum0 = sum_input and summed0 is not None

    bt = _pick_row_tile(B)
    nb = B // bt
    # Tc: largest divisor of T within a VMEM budget and a modest unroll cap.
    mem_cap = max(1, (8 * 1024 * 1024) //
                  (bt * N * (jnp.dtype(xs.dtype).itemsize + 1) * 2))
    tc = _largest_divisor_leq(T, min(64, mem_cap))
    nt = T // tc

    in_specs = [pl.BlockSpec((tc, bt, N), lambda b, t: (t, b, 0))]
    inputs = [xs]
    if has_trace0:
        in_specs.append(pl.BlockSpec((bt, N), lambda b, t: (b, 0)))
        inputs.append(x_trace0.astype(jnp.float32))
    if has_sum0:
        in_specs.append(pl.BlockSpec((bt, N), lambda b, t: (b, 0)))
        inputs.append(summed0.astype(jnp.float32))

    out_specs = [pl.BlockSpec((tc, bt, N), lambda b, t: (t, b, 0))]
    out_shapes = [jax.ShapeDtypeStruct((T, B, N), jnp.int8)]
    if traces:       # resident accumulator: same block for every t, written back per row tile
        out_specs.append(pl.BlockSpec((bt, N), lambda b, t: (b, 0)))
        out_shapes.append(jax.ShapeDtypeStruct((B, N), jnp.float32))
    if sum_input:
        out_specs.append(pl.BlockSpec((bt, N), lambda b, t: (b, 0)))
        out_shapes.append(jax.ShapeDtypeStruct((B, N), jnp.float32))

    kernel = partial(_mp_fused_kernel, thresh=float(thresh), tc=tc, traces=traces,
                     traces_additive=traces_additive, trace_decay=trace_decay,
                     trace_scale=float(trace_scale), sum_input=sum_input,
                     has_trace0=has_trace0, has_sum0=has_sum0)

    outs = pl.pallas_call(
        kernel,
        grid=(nb, nt),                       # rows parallel (v7x megacore), T-chunks carry
        in_specs=in_specs,
        out_specs=tuple(out_specs),
        out_shape=tuple(out_shapes),
        compiler_params=pltpu.CompilerParams(
            dimension_semantics=("parallel", "arbitrary")),
    )(*inputs)

    result = {"s": outs[0], "v": xs[-1]}
    i = 1
    if traces:
        result["x_trace"] = outs[i]; i += 1
    if sum_input:
        result["summed"] = outs[i]; i += 1
    return result


# ----------------------------------------------------------------------------- demo

if __name__ == "__main__":
    key = jax.random.PRNGKey(0)
    T, B, N = 8, 2, 128          # steps, batch, neurons
    thresh = 1.0                 # module default

    xs = 1.5 * jax.random.normal(key, (T, B, N), jnp.float32)
    xs_np = np.asarray(xs)
    ref_s = xs_np >= thresh

    # --- default config (traces=False, sum_input=False): one lane-dense pass ----------
    out = mcculloch_pitts_run(xs, thresh=thresh)
    jax.block_until_ready(out)
    assert out["s"].dtype == jnp.int8
    assert np.array_equal(np.asarray(out["s"]).astype(bool), ref_s)
    assert np.allclose(np.asarray(out["v"]), xs_np[-1])

    # --- single-step API, mirrors McCullochPitts.forward ------------------------------
    v1, s1 = mcculloch_pitts_forward(xs[0], thresh=thresh)
    jax.block_until_ready((v1, s1))
    assert np.array_equal(np.asarray(s1).astype(bool), ref_s[0])
    assert np.allclose(np.asarray(v1), xs_np[0])

    # --- base-class trace / sum_input bookkeeping (chunked steps, resident VMEM carry)
    # NOTE: the reference module's non-additive path is masked_fill_(s, trace_scale);
    # demo uses the default trace_scale=1.0.
    out2 = mcculloch_pitts_run(xs, thresh=thresh, traces=True, traces_additive=False,
                               tc_trace=20.0, trace_scale=1.0, sum_input=True, dt=1.0)
    jax.block_until_ready(out2)

    trace_decay = np.exp(-1.0 / 20.0)
    xtr_ref = np.zeros((B, N), np.float32)
    sum_ref = np.zeros((B, N), np.float32)
    for t in range(T):
        s_t = xs_np[t] >= thresh
        xtr_ref = xtr_ref * trace_decay
        xtr_ref = np.where(s_t, 1.0, xtr_ref)       # masked_fill_(s, trace_scale=1.0)
        sum_ref = sum_ref + xs_np[t]
    assert np.array_equal(np.asarray(out2["s"]).astype(bool), ref_s)
    assert np.allclose(np.asarray(out2["x_trace"]), xtr_ref, atol=1e-5)
    assert np.allclose(np.asarray(out2["summed"]), sum_ref, atol=1e-5)

    print("KERNEL_OK")
</pallas_src>

<mosaic_0001>
module attributes {stable_mosaic.version = 11 : i64} {
  func.func @_mp_threshold_kernel(%arg0: i32, %arg1: memref<1x2048xf32, #tpu.memory_space<vmem>>, %arg2: memref<1x2048xi8, #tpu.memory_space<vmem>>) attributes {dimension_semantics = [#tpu.dimension_semantics<parallel>], iteration_bounds = array<i64: 1>, scalar_prefetch = 0 : i64, scratch_operands = 0 : i64, tpu.core_type = #tpu.core_type<tc>, window_params = [{transform_indices = @transform_0, window_bounds = array<i64: 1, 2048>}, {transform_indices = @transform_1, window_bounds = array<i64: 1, 2048>}]} {
    %c0 = arith.constant 0 : index
    %c0_0 = arith.constant 0 : index
    %0 = vector.load %arg1[%c0, %c0_0] : memref<1x2048xf32, #tpu.memory_space<vmem>>, vector<1x2048xf32>
    %cst = arith.constant 1.000000e+00 : f32
    %1 = vector.broadcast %cst : f32 to vector<1x2048xf32>
    %2 = arith.cmpf oge, %0, %1 : vector<1x2048xf32>
    %3 = arith.extui %2 : vector<1x2048xi1> to vector<1x2048xi8>
    %c0_1 = arith.constant 0 : index
    %c0_2 = arith.constant 0 : index
    %4 = vector.load %arg2[%c0_1, %c0_2] : memref<1x2048xi8, #tpu.memory_space<vmem>>, vector<1x2048xi8>
    tpu.vector_store %arg2[%c0_1, %c0_2], %3 {strides = array<i32>} : memref<1x2048xi8, #tpu.memory_space<vmem>>, vector<1x2048xi8>,
    return
  }
  func.func @transform_0(%arg0: i32) -> (i32, i32) {
    %c0_i32 = arith.constant 0 : i32
    %c0_i32_0 = arith.constant 0 : i32
    return %arg0, %c0_i32 : i32, i32
  }
  func.func @transform_1(%arg0: i32) -> (i32, i32) {
    %c0_i32 = arith.constant 0 : i32
    %c0_i32_0 = arith.constant 0 : i32
    return %arg0, %c0_i32 : i32, i32
  }
}

</mosaic_0001>

<bundles_post_ra>
// kernel: tpu_custom_call.1
= control target key start
LH: loop header
LB: loop body
LE: loop exit
PB: predicated region body
PF: predicated region fallthrough
CT: control target
= control target key end

     0   :  { %6 = vsyncpa [#allocation3], 0  ;;  %s622_s0 = inlined_call_operand.hbm [shape: f32[1,2048], index: 0, kind: input, shape index: {}]   ;;  %s623_s1 = inlined_call_operand.hbm [shape: s8[1,2048], index: 1, kind: output, shape index: {}]  }
   0x1   :  { %7 = vsyncpa [#allocation4], 0  ;;  %s447_s6 = smov [#allocation2]   ;;  %s399_s10 = scalar_lea.hbm %s622_s0, 256 }
   0x2   :  { %s14_s7 = sshll.u32 %s447_s6, 4  ;;  %p400_p0 = scmp.ne.s32.totalorder %s622_s0, %s399_s10  ;;  %s15_s7 = int_to_ptr.vmem [resolvable:$true] %s14_s7 }
   0x3   :  { %p403_p1 = scmp.lt.u32.totalorder %s399_s10, %s622_s0 }
   0x5   :  { %p405_p2 = pnand %p403_p1, %p400_p0 }
   0x7   :  { %408 = shalt.err (!%p405_p2)
}
   0x8   :  { %s409_s15 = scalar_lea.vmem %s15_s7, 256  ;;  %p414_p4 = scmp.lt.s32.totalorder %s15_s7, %s15_s7 }
   0x9   :  { %p410_p3 = scmp.ne.s32.totalorder %s15_s7, %s409_s15  ;;  %p415_p5 = scmp.lt.s32.totalorder %s409_s15, %s409_s15 }
   0xb   :  { %p416_p6 = por %p415_p5, %p414_p4 }
   0xd   :  { %p417_p7 = pnand %p416_p6, %p410_p3 }
   0xf   :  { %420 = shalt.err (!%p417_p7)
}
  0x10   :  { %17 = dma.hbm_to_vmem [thread:$0]  %s622_s0, 256, %s15_s7, [#allocation3]  }
  0x11   :  { %443 = dma.done.wait [#allocation3], 256  }
  0x12   :  { %444 = vsyncadd [#allocation3], 4294967040  ;;  %v32_v0 = vlaneseq  ;;  %v448_v1 = vmov 286326784   ;;  %v449_v3 = vmov 858989090   ;;  %v23_v18 = vld [vmem:[#allocation2] sm:$0xff] }
  0x13   :  { %v30_v2 = vunpack.c.l.s4 %v448_v1  ;;  %v37_v4 = vunpack.c.l.s4 %v449_v3  ;;  %v450_v6 = vmov 1431651396   ;;  %v451_v8 = vmov 2004313702   ;;  %v24_v23 = vld [vmem:[#allocation2 + $0x8] sm:$0xff]  ;;  %s454_s0 = smov [#allocation5]  }
  0x14   :  { %v33_v5 = vshrl.u32 %v32_v0, 7  ;;  %v44_v7 = vunpack.c.l.s4 %v450_v6  ;;  %v51_v9 = vunpack.c.l.s4 %v451_v8  ;;  %v452_v19 = vmov 1966171168   ;;  %s382_s18 = sshll.u32 %s454_s0, 4  ;;  %s383_s18 = int_to_ptr.vmem [resolvable:$true] %s382_s18 }
  0x15   :  { %v31_v10 = vunpack.c.0.s8 %v30_v2  ;;  %v38_v11 = vunpack.c.0.s8 %v37_v4  ;;  %v113_v20 = vunpack.c.l.s4 %v452_v19  ;;  %vm25_vm0 = vcmp.ge.f32.partialorder %v23_v18, 1.0  ;;  %s421_s19 = scalar_lea.vmem %s383_s18, 256  ;;  %p426_p9 = scmp.lt.s32.totalorder %s383_s18, %s383_s18 }
  0x16   :  { %v45_v12 = vunpack.c.0.s8 %v44_v7  ;;  %v52_v13 = vunpack.c.0.s8 %v51_v9  ;;  %vm339_vm1 = vcmask 1040384   ;;  %vm340_vm2 = vsmask.f32 0  ;;  %p422_p8 = scmp.ne.s32.totalorder %s383_s18, %s421_s19  ;;  %p427_p10 = scmp.lt.s32.totalorder %s421_s19, %s421_s19 }
  0x17   :  { %v34_v14 = vsub.s32 %v31_v10, %v33_v5  ;;  %v41_v15 = vsub.s32 %v38_v11, %v33_v5  ;;  %v453_v21 = vmov 0   ;;  %vm342_vm3 = vcmask 1041409   ;;  %vm478_vm5 = vmand %vm339_vm1, %vm340_vm2 }
  0x18   :  { %v48_v16 = vsub.s32 %v45_v12, %v33_v5  ;;  %v55_v17 = vsub.s32 %v52_v13, %v33_v5  ;;  %v27_v22 = vsel %vm25_vm0, 1, %v453_v21  ;;  %vm343_vm4 = vsmask.f32 1024  ;;  %p428_p11 = por %p427_p10, %p426_p9 }
  0x19   :  { %v35_v24 = vrot.slane %v27_v22, %v34_v14  ;;  %v42_v25 = vrot.slane %v27_v22, %v41_v15  ;;  %v114_v28 = vunpack.c.0.s8 %v113_v20  ;;  %vm346_vm6 = vcmask 1042434   ;;  %vm484_vm13 = vmand %vm342_vm3, %vm343_vm4 }
  0x1a   :  { %v49_v26 = vrot.slane %v27_v22, %v48_v16  ;;  %v56_v27 = vrot.slane %v27_v22, %v55_v17  ;;  %vm347_vm7 = vsmask.f32 2048  ;;  %vm26_vm8 = vcmp.ge.f32.partialorder %v24_v23, 1.0  ;;  %vm345_vm14 = vmor %vm484_vm13, %vm478_vm5  ;;  %p429_p12 = pnand %p428_p11, %p422_p8 }
  0x1b   :  { %vm85_vm9 = vcmp.ne.s32.totalorder %v35_v24, 0  ;;  %vm86_vm10 = vcmp.ne.s32.totalorder %v42_v25, 0  ;;  %v28_v37 = vsel %vm26_vm8, 1, %v453_v21  ;;  %v497_v43 = vsub.s32 %v114_v28, %v33_v5  ;;  %vm348_vm15 = vmand %vm346_vm6, %vm347_vm7 }
  0x1c   :  { %vm87_vm11 = vcmp.ne.s32.totalorder %v49_v26, 0  ;;  %vm88_vm12 = vcmp.ne.s32.totalorder %v56_v27, 0  ;;  %v93_v31 = vsel %vm85_vm9, 1, %v453_v21  ;;  %v94_v32 = vsel %vm86_vm10, 1, %v453_v21  ;;  %vm510_vm6 = vmor %vm348_vm15, %vm345_vm14 }
  0x1d   :  { %v95_v33 = vsel %vm87_vm11, 1, %v453_v21  ;;  %v96_v34 = vsel %vm88_vm12, 1, %v453_v21  ;;  %v101_v35 = vpack.c.b16 %v94_v32, %v93_v31  ;;  %v63_v38 = vrot.slane %v28_v37, %v34_v14 }
  0x1e   :  { %v102_v36 = vpack.c.b16 %v96_v34, %v95_v33  ;;  %v70_v39 = vrot.slane %v28_v37, %v41_v15  ;;  %v77_v40 = vrot.slane %v28_v37, %v48_v16  ;;  %v84_v41 = vrot.slane %v28_v37, %v55_v17 }
  0x1f   :  { %vm350_vm0 = vcmask 1043459   ;;  %vm351_vm1 = vsmask.f32 3072  ;;  %vm89_vm2 = vcmp.ne.s32.totalorder %v63_v38, 0  ;;  %vm354_vm10 = vcmask 1044484  }
  0x20   :  { %v103_v42 = vpack.c.b8 %v102_v36, %v101_v35  ;;  %vm90_vm3 = vcmp.ne.s32.totalorder %v70_v39, 0  ;;  %vm91_vm4 = vcmp.ne.s32.totalorder %v77_v40, 0  ;;  %vm92_vm8 = vcmp.ne.s32.totalorder %v84_v41, 0  ;;  %vm518_vm7 = vmand %vm350_vm0, %vm351_vm1  ;;  %v370_v40 = vld [vmem:[#allocation5] sm:$0xff] }
  0x21   :  { %v97_v44 = vsel %vm89_vm2, 1, %v453_v21  ;;  %v98_v45 = vsel %vm90_vm3, 1, %v453_v21  ;;  %v99_v46 = vsel %vm91_vm4, 1, %v453_v21  ;;  %v100_v49 = vsel %vm92_vm8, 1, %v453_v21  ;;  %vm353_vm5 = vmor %vm518_vm7, %vm510_vm6 }
  0x22   :  { %vm107_vm9 = vnez %v103_v42  ;;  %v104_v50 = vpack.c.b16 %v98_v45, %v97_v44  ;;  %v105_v54 = vpack.c.b16 %v100_v49, %v99_v46  ;;  %vm355_vm11 = vsmask.f32 4096 }
  0x23   :  { %v109_v47 = vsel %vm107_vm9, 16843009, %v453_v21  ;;  %vm358_vm12 = vcmask 1045509   ;;  %vm359_vm13 = vsmask.f32 5120  ;;  %vm356_vm14 = vmand %vm354_vm10, %vm355_vm11 }
  0x24   :  { %v111_v51 = vcombine.high %v109_v47, %v109_v47  ;;  %v118_v52 = vrot.slane %v109_v47, %v497_v43  ;;  %v106_v58 = vpack.c.b8 %v105_v54, %v104_v50  ;;  %vm538_vm9 = vmor %vm356_vm14, %vm353_vm5  ;;  %vm636_vm5 = vsmask.f32 6144 }
  0x25   :  { %vm544_vm1 = vmand %vm358_vm12, %vm359_vm13  ;;  %vm637_vm12 = vcmask 1046534   ;;  %vm366_vm14 = vcmask 1047559  }
  0x26   :  { %v125_v55 = vrot.slane %v111_v51, %v497_v43  ;;  %v126_v56 = vcombine.high %v118_v52, %v118_v52  ;;  %v134_v57 = vrot.slane %v118_v52, %v497_v43  ;;  %vm108_vm2 = vnez %v106_v58  ;;  %vm361_vm7 = vmor %vm544_vm1, %vm538_vm9 }
  0x27   :  { %v110_v17 = vsel %vm108_vm2, 16843009, %v453_v21  ;;  %vm364_vm13 = vmand %vm637_vm12, %vm636_vm5 }
  0x28   :  { %v127_v59 = vcombine.high %v125_v55, %v125_v55  ;;  %v141_v60 = vrot.slane %v125_v55, %v497_v43  ;;  %v148_v61 = vrot.slane %v126_v56, %v497_v43  ;;  %v156_v62 = vcombine.high %v134_v57, %v134_v57 }
  0x29   :  { %vm209_vm15 = vnez %v134_v57  ;;  %v160_v20 = vcombine.high %v110_v17, %v110_v17  ;;  %v167_v22 = vrot.slane %v110_v17, %v497_v43 }
  0x2a   :  { %v155_v63 = vrot.slane %v127_v59, %v497_v43  ;;  %v157_v0 = vcombine.high %v141_v60, %v141_v60  ;;  %v158_v1 = vcombine.high %v148_v61, %v148_v61  ;;  %vm210_vm3 = vnez %v148_v61 }
  0x2b   :  { %vm211_vm4 = vnez %v156_v62  ;;  %vm213_vm8 = vnez %v141_v60  ;;  %v225_v2 = vsel %vm209_vm15, 16843009, %v453_v21  ;;  %v226_v3 = vsel %vm210_vm3, 16843009, %v453_v21 }
  0x2c   :  { %v159_v5 = vcombine.high %v155_v63, %v155_v63  ;;  %vm212_vm10 = vnez %v158_v1  ;;  %vm214_vm11 = vnez %v155_v63  ;;  %vm215_vm0 = vnez %v157_v0 }
  0x2d   :  { %v227_v7 = vsel %vm211_vm4, 16843009, %v453_v21  ;;  %v228_v8 = vsel %vm212_vm10, 16843009, %v453_v21  ;;  %v229_v9 = vsel %vm213_vm8, 16843009, %v453_v21  ;;  %v241_v10 = vcombine.low %v225_v2, %v226_v3 }
  0x2e   :  { %vm216_vm6 = vnez %v159_v5  ;;  %v230_v11 = vsel %vm214_vm11, 16843009, %v453_v21  ;;  %v231_v12 = vsel %vm215_vm0, 16843009, %v453_v21  ;;  %v242_v13 = vcombine.low %v227_v7, %v228_v8  ;;  %vm568_vm0 = vmor %vm364_vm13, %vm361_vm7 }
  0x2f   :  { %v232_v14 = vsel %vm216_vm6, 16843009, %v453_v21  ;;  %v243_v15 = vcombine.low %v229_v9, %v230_v11  ;;  %v251_v16 = vrot.slane %v241_v10, %v497_v43  ;;  %vm367_vm15 = vsmask.f32 7168 }
  0x30   :  { %v244_v18 = vcombine.low %v231_v12, %v232_v14  ;;  %v258_v19 = vrot.slane %v242_v13, %v497_v43  ;;  %v174_v26 = vrot.slane %v160_v20, %v497_v43  ;;  %v175_v27 = vcombine.high %v167_v22, %v167_v22  ;;  %vm574_vm1 = vmand %vm366_vm14, %vm367_vm15 }
  0x31   :  { %v265_v23 = vrot.slane %v243_v15, %v497_v43  ;;  %v183_v29 = vrot.slane %v167_v22, %v497_v43  ;;  %vm369_vm4 = vmor %vm574_vm1, %vm568_vm0 }
  0x32   :  { %v272_v24 = vrot.slane %v244_v18, %v497_v43  ;;  %v273_v25 = vcombine.low %v251_v16, %v258_v19  ;;  %v176_v33 = vcombine.high %v174_v26, %v174_v26  ;;  %v190_v34 = vrot.slane %v174_v26, %v497_v43 }
  0x33   :  { %v197_v35 = vrot.slane %v175_v27, %v497_v43  ;;  %v205_v36 = vcombine.high %v183_v29, %v183_v29  ;;  %vm217_vm2 = vnez %v183_v29 }
  0x34   :  { %v274_v30 = vcombine.low %v265_v23, %v272_v24  ;;  %v281_v31 = vrot.slane %v273_v25, %v497_v43  ;;  %v204_v38 = vrot.slane %v176_v33, %v497_v43  ;;  %v206_v39 = vcombine.high %v190_v34, %v190_v34 }
  0x35   :  { %vm221_vm3 = vnez %v190_v34  ;;  %v207_v41 = vcombine.high %v197_v35, %v197_v35  ;;  %vm218_vm8 = vnez %v197_v35  ;;  %vm219_vm9 = vnez %v205_v36 }
  0x36   :  { %v288_v37 = vrot.slane %v274_v30, %v497_v43  ;;  %v233_v42 = vsel %vm217_vm2, 16843009, %v453_v21  ;;  %v208_v45 = vcombine.high %v204_v38, %v204_v38  ;;  %vm222_vm10 = vnez %v204_v38 }
  0x37   :  { %vm223_vm11 = vnez %v206_v39  ;;  %vm220_vm6 = vnez %v207_v41  ;;  %v234_v46 = vsel %vm218_vm8, 16843009, %v453_v21  ;;  %v235_v47 = vsel %vm219_vm9, 16843009, %v453_v21 }
  0x38   :  { %v289_v44 = vcombine.low %v281_v31, %v288_v37  ;;  %v237_v48 = vsel %vm221_vm3, 16843009, %v453_v21  ;;  %vm224_vm7 = vnez %v208_v45  ;;  %v236_v50 = vsel %vm220_vm6, 16843009, %v453_v21 }
  0x39   :  { %v238_v51 = vsel %vm222_vm10, 16843009, %v453_v21  ;;  %v239_v52 = vsel %vm223_vm11, 16843009, %v453_v21  ;;  %v240_v53 = vsel %vm224_vm7, 16843009, %v453_v21  ;;  %v290_v54 = vcombine.low %v233_v42, %v234_v46 }
  0x3a   :  { %v371_v49 = vsel %vm369_vm4, %v289_v44, %v370_v40  ;;  %v291_v55 = vcombine.low %v235_v47, %v236_v50  ;;  %v292_v56 = vcombine.low %v237_v48, %v238_v51  ;;  %v293_v57 = vcombine.low %v239_v52, %v240_v53  ;;  %v373_v21 = vld [vmem:[#allocation5 + $0x8] sm:$0xff] }
  0x3b   :  { %372 = vst [vmem:[#allocation5] sm:$0xff] %v371_v49  ;;  %v300_v58 = vrot.slane %v290_v54, %v497_v43 }
  0x3c   :  { %v307_v59 = vrot.slane %v291_v55, %v497_v43  ;;  %v314_v60 = vrot.slane %v292_v56, %v497_v43  ;;  %v321_v61 = vrot.slane %v293_v57, %v497_v43 }
  0x3e   :  { %v322_v62 = vcombine.low %v300_v58, %v307_v59  ;;  %v323_v63 = vcombine.low %v314_v60, %v321_v61 }
  0x40   :  { %v330_v0 = vrot.slane %v322_v62, %v497_v43  ;;  %v337_v1 = vrot.slane %v323_v63, %v497_v43 }
  0x42   :  { %v338_v2 = vcombine.low %v330_v0, %v337_v1 }
  0x44   :  { %v374_v3 = vsel %vm369_vm4, %v338_v2, %v373_v21 }
  0x45   :  { %375 = vst [vmem:[#allocation5 + $0x8] sm:$0xff] %v374_v3 }
  0x46   :  { %432 = shalt.err (!%p429_p12)
}
  0x47   :  { %s433_s22 = scalar_lea.hbm %s623_s1, 256 }
  0x48   :  { %p434_p13 = scmp.ne.s32.totalorder %s623_s1, %s433_s22  ;;  %p437_p0 = scmp.lt.u32.totalorder %s433_s22, %s623_s1 }
  0x4a   :  { %p439_p1 = pnand %p437_p0, %p434_p13 }
  0x4c   :  { %442 = shalt.err (!%p439_p1)
}
  0x4d   :  { %385 = dma.vmem_to_hbm [thread:$0]  %s383_s18, 256, %s623_s1, [#allocation4]  }
  0x4e   :  { %445 = dma.done.wait [#allocation4], 256  }
  0x4f   :  { %446 = vsyncadd [#allocation4], 4294967040 }
  0x50   :  { %389 = vsyncpa [#allocation3], 1 }
  0x51   :  { %390 = vsyncpa [#allocation4], 1 }

</bundles_post_ra>
